<compile_context>
chip_gen: v7x
topology: tpu7x:2x2x1
jax: 0.10.0
libtpu: 0.0.40
codegen_flags: <defaults>
</compile_context>

<pallas_src>
import jax
import jax.numpy as jnp
from jax.experimental import pallas as pl
from jax.experimental.pallas import tpu as pltpu


def _round_up(x, m):
    return (x + m - 1) // m * m


# --------------------------------------------------------------------------- #
# Kernel                                                                       #
# --------------------------------------------------------------------------- #
def _agg_kernel(x_ref, w_ref, b_ref, wn_ref, o_ref):
    """One (D_out-tile j, batch-tile i, neighbor-slot k) grid step.

    x_ref:  (tb, d_in_pad) bf16  features of neighbor slot k for tb target nodes
    w_ref:  (d_in_pad, tn) bf16  Linear weight tile (transposed), resident along (i, k)
    b_ref:  (1, tn)        f32   Linear bias tile, resident along (i, k)
    wn_ref: (tb, 1)        f32   pre-normalized weight of neighbor slot k per node
    o_ref:  (tb, tn)       f32   output block, resident / accumulated along k
    """
    k = pl.program_id(2)

    @pl.when(k == 0)
    def _():
        o_ref[...] = jnp.zeros_like(o_ref)

    # hiddens = relu(X_k @ W + b): bf16 operands, f32 accumulation on the MXU.
    h = jnp.dot(x_ref[...], w_ref[...], preferred_element_type=jnp.float32)
    h = jnp.maximum(h + b_ref[...], 0.0)

    # agg += wn_k * hiddens: per-row scale + add on the VPU, hidden under MXU.
    o_ref[...] += wn_ref[...] * h


# --------------------------------------------------------------------------- #
# Tiling                                                                       #
# --------------------------------------------------------------------------- #
def _choose_tiles(batch, d_in_pad, d_out_pad):
    """Pick (tb, tn) so the double-buffered tiles fit a VMEM budget that is
    safe across generations: v5e (16 MiB default scoped), v6e (128 MiB phys)
    and v7x (64 MiB phys)."""
    budget = 12 << 20  # bytes, including the 2x double-buffer factor

    def tiles_bytes(tb, tn):
        x_t = tb * d_in_pad * 2            # bf16 neighbor-feature tile
        w_t = d_in_pad * tn * 2            # bf16 weight tile
        b_t = 8 * tn * 4                   # f32 bias tile (sublane-padded)
        wn_t = tb * 128 * 4                # f32 per-node weight tile (lane-padded)
        o_t = tb * tn * 4                  # f32 output tile
        return 2 * (x_t + w_t + b_t + wn_t + o_t)

    tb_cap = min(512, _round_up(batch, 8))
    # Prefer an untiled D_out (n_j == 1): the gathered X then streams from HBM
    # exactly once.  Fall back to narrower D_out tiles only if that would
    # squeeze the batch tile below 64 rows.
    tn_opts = [d_out_pad] + [t for t in (512, 256, 128)
                             if t < d_out_pad and d_out_pad % t == 0]
    choice = None
    for tn in tn_opts:
        tb = tb_cap
        while tb > 8 and tiles_bytes(tb, tn) > budget:
            tb -= 8
        if tiles_bytes(tb, tn) > budget:
            continue
        choice = (tb, tn)
        if tb >= min(64, tb_cap):
            break
    if choice is None:
        # TODO(synk): add a d_in reduction grid axis (VMEM accumulator) for
        # input_dim too large for a single (8, d_in_pad) tile.
        choice = (8, 128)
    return choice


# --------------------------------------------------------------------------- #
# Wrapper                                                                      #
# --------------------------------------------------------------------------- #
@jax.jit
def _aggregate_batched(feat_table, nbr_idx, nbr_wt, weight, bias):
    """Aggregate B target nodes in a single pallas_call.

    feat_table: (num_nodes, D_in)  dense node-feature table
    nbr_idx:    (B, N) int32       neighbor row indices into feat_table
    nbr_wt:     (B, N) float       raw (unnormalized) neighbor weights
    weight:     (D_out, D_in) f32  nn.Linear weight
    bias:       (D_out,) f32       nn.Linear bias
    returns:    (B, D_out) f32
    """
    B, N = nbr_idx.shape
    d_in = feat_table.shape[1]
    d_out = weight.shape[0]
    if N == 0:
        return jnp.zeros((B, d_out), jnp.float32)

    d_in_pad = _round_up(d_in, 128)
    d_out_pad = _round_up(d_out, 128)

    tb, tn = _choose_tiles(B, d_in_pad, d_out_pad)
    b_pad = _round_up(B, tb)
    n_i = b_pad // tb
    n_j = d_out_pad // tn
    # v7x megacore: ensure >= 2 "parallel" grid steps when the batch allows it,
    # so both TensorCores get work.
    if n_i * n_j < 2 and _round_up(B, 8) >= 16:
        tb = _round_up(_round_up(B, 8) // 2, 8)
        b_pad = _round_up(B, tb)
        n_i = b_pad // tb

    # --- neighbor weights: normalize ONCE (exact f32), neighbor-major layout --
    # Precondition (same as the PyTorch module): sum(weights) != 0 per node.
    wn = nbr_wt.astype(jnp.float32)
    wn = wn / jnp.sum(wn, axis=1, keepdims=True)           # (B, N)
    wn_t = jnp.pad(wn.T, ((0, 0), (0, b_pad - B)))         # (N, b_pad); pads = 0
    wn_flat = wn_t.reshape(N * b_pad, 1)                   # no 0/0 anywhere

    # --- neighbor features: gather in bf16, neighbor-major --------------------
    # TODO(synk): fuse this gather into the kernel via pl.ANY + scalar-prefetch
    # driven make_async_copy DMAs (removes the gathered-X HBM round-trip).
    feat16 = feat_table.astype(jnp.bfloat16)
    idx_t = jnp.pad(nbr_idx.astype(jnp.int32).T, ((0, 0), (0, b_pad - B)))
    x = jnp.take(feat16, idx_t.reshape(-1), axis=0)        # (N*b_pad, d_in) bf16
    x = jnp.pad(x, ((0, 0), (0, d_in_pad - d_in)))         # (N*b_pad, d_in_pad)

    w_t = jnp.pad(weight.astype(jnp.float32).T,
                  ((0, d_in_pad - d_in), (0, d_out_pad - d_out))).astype(jnp.bfloat16)
    b2 = jnp.pad(bias.astype(jnp.float32),
                 (0, d_out_pad - d_out)).reshape(1, d_out_pad)

    cost = pl.CostEstimate(
        flops=2 * b_pad * N * d_in_pad * d_out_pad + 2 * b_pad * N * d_out_pad,
        transcendentals=0,
        bytes_accessed=(x.size * 2 * n_j + wn_flat.size * 4 * n_j
                        + w_t.size * 2 + b2.size * 4 + b_pad * d_out_pad * 4),
    )

    out = pl.pallas_call(
        _agg_kernel,
        out_shape=jax.ShapeDtypeStruct((b_pad, d_out_pad), jnp.float32),
        grid_spec=pltpu.PrefetchScalarGridSpec(
            num_scalar_prefetch=0,
            # j (D_out tile) outer, i (batch tile) middle, k (neighbor slot)
            # inner.  W / bias depend only on j -> read from HBM once; the
            # output block depends on (i, j) -> resident (accumulated) across
            # the whole inner k sweep.
            grid=(n_j, n_i, N),
            in_specs=[
                pl.BlockSpec((tb, d_in_pad), lambda j, i, k: (k * n_i + i, 0)),  # X_k
                pl.BlockSpec((d_in_pad, tn), lambda j, i, k: (0, j)),            # W^T
                pl.BlockSpec((1, tn), lambda j, i, k: (0, j)),                   # bias
                pl.BlockSpec((tb, 1), lambda j, i, k: (k * n_i + i, 0)),         # wn_k
            ],
            out_specs=pl.BlockSpec((tb, tn), lambda j, i, k: (i, j)),
        ),
        compiler_params=pltpu.CompilerParams(
            dimension_semantics=("parallel", "parallel", "arbitrary"),
            vmem_limit_bytes=32 << 20,
        ),
        cost_estimate=cost,
    )(x, w_t, b2, wn_flat)

    return out[:B, :d_out]


# --------------------------------------------------------------------------- #
# Module wrapper                                                               #
# --------------------------------------------------------------------------- #
class AggregatorJax:
    """JAX/Pallas port of the PyTorch PinSAGE Aggregator module."""

    def __init__(self, input_dim, output_dim, key):
        self.input_dim = input_dim
        self.output_dim = output_dim
        k_w, k_b = jax.random.split(key)
        bound = 1.0 / (input_dim ** 0.5)
        self.weight = jax.random.uniform(
            k_w, (output_dim, input_dim), jnp.float32, -bound, bound)
        self.bias = jax.random.uniform(
            k_b, (output_dim,), jnp.float32, -bound, bound)

    # ---- fast path: many target nodes against a dense feature table --------
    def forward_batched(self, feat_table, nbr_idx, nbr_wt):
        return _aggregate_batched(feat_table, nbr_idx.astype(jnp.int32),
                                  nbr_wt, self.weight, self.bias)

    # ---- spec-parity path: single target node, dict-based features ---------
    def forward(self, neighbors, features_map):
        n_neighbors = len(neighbors)
        if n_neighbors == 0:
            # Mirrors the PyTorch reference, which returns zeros of size
            # input_dim (not output_dim) for the empty-neighbor case.
            return jnp.zeros((self.input_dim,), jnp.float32)
        neighbor_indices = [v for v, _ in neighbors]
        assert features_map[neighbor_indices[0]].shape[0] == self.input_dim
        # Densify the dict-based API once (host glue imposed by the spec),
        # then route through the batched on-device path with B = 1.
        node_ids = list(features_map.keys())
        row_of = {v: i for i, v in enumerate(node_ids)}
        feat_table = jnp.stack([features_map[v] for v in node_ids], axis=0)
        nbr_idx = jnp.array([[row_of[v] for v, _ in neighbors]], dtype=jnp.int32)
        nbr_wt = jnp.array([[w for _, w in neighbors]], dtype=jnp.float32)
        return self.forward_batched(feat_table, nbr_idx, nbr_wt)[0]


# --------------------------------------------------------------------------- #
# Pure-JAX reference (X / W rounded to bf16 to match the kernel's MXU inputs)  #
# --------------------------------------------------------------------------- #
def _reference_batched(feat_table, nbr_idx, nbr_wt, weight, bias):
    x = feat_table.astype(jnp.bfloat16).astype(jnp.float32)[nbr_idx]      # (B,N,Din)
    w = weight.astype(jnp.bfloat16).astype(jnp.float32)                   # (Dout,Din)
    h = jnp.maximum(
        jnp.einsum("bnd,od->bno", x, w, precision=jax.lax.Precision.HIGHEST)
        + bias, 0.0)
    wn = nbr_wt / nbr_wt.sum(axis=1, keepdims=True)
    return jnp.einsum("bn,bno->bo", wn, h, precision=jax.lax.Precision.HIGHEST)


if __name__ == "__main__":
    key = jax.random.PRNGKey(0)
    k_mod, k_feat, k_idx, k_wt, k_mod2, k_feat2, k_idx2, k_wt2 = jax.random.split(key, 8)

    # ---- test 1: batched aggregation, two batch tiles ------------------------
    input_dim, output_dim = 96, 80          # padded to 128 / 128 inside the kernel
    num_nodes, batch, n_nbrs = 64, 128, 5

    agg = AggregatorJax(input_dim, output_dim, k_mod)
    feat_table = jax.random.normal(k_feat, (num_nodes, input_dim), jnp.float32)
    nbr_idx = jax.random.randint(k_idx, (batch, n_nbrs), 0, num_nodes, jnp.int32)
    nbr_wt = jax.random.uniform(k_wt, (batch, n_nbrs), jnp.float32, 0.1, 1.0)

    out = jax.block_until_ready(agg.forward_batched(feat_table, nbr_idx, nbr_wt))
    ref = _reference_batched(feat_table, nbr_idx, nbr_wt, agg.weight, agg.bias)
    assert out.shape == (batch, output_dim)
    assert jnp.allclose(out, ref, atol=2e-2, rtol=2e-2)

    # ---- test 2: D_out > 128 (single wide output tile, tn = 384) ------------
    agg2 = AggregatorJax(64, 320, k_mod2)   # D_out pads to 384
    feat_table2 = jax.random.normal(k_feat2, (32, 64), jnp.float32)
    nbr_idx2 = jax.random.randint(k_idx2, (8, 4), 0, 32, jnp.int32)
    nbr_wt2 = jax.random.uniform(k_wt2, (8, 4), jnp.float32, 0.1, 1.0)

    out2 = jax.block_until_ready(agg2.forward_batched(feat_table2, nbr_idx2, nbr_wt2))
    ref2 = _reference_batched(feat_table2, nbr_idx2, nbr_wt2, agg2.weight, agg2.bias)
    assert out2.shape == (8, 320)
    assert jnp.allclose(out2, ref2, atol=2e-2, rtol=2e-2)

    # ---- test 3: spec-parity single-target forward(neighbors, features_map) -
    node_ids = [3, 7, 11, 15, 19, 23, 27, 31, 35, 39]
    feat_keys = jax.random.split(k_feat, len(node_ids))
    features_map = {
        v: jax.random.normal(feat_keys[i], (input_dim,), jnp.float32)
        for i, v in enumerate(node_ids)
    }
    raw_w = jax.random.uniform(k_wt, (6,), jnp.float32, 0.1, 1.0)
    neighbors = [(node_ids[i], float(raw_w[i])) for i in range(6)]

    out3 = jax.block_until_ready(agg.forward(neighbors, features_map))
    xs = jnp.stack([features_map[v] for v, _ in neighbors], axis=0)
    ws = jnp.array([w for _, w in neighbors], jnp.float32)
    ref3 = _reference_batched(xs, jnp.arange(len(neighbors))[None, :],
                              ws[None, :], agg.weight, agg.bias)[0]
    assert out3.shape == (output_dim,)
    assert jnp.allclose(out3, ref3, atol=2e-2, rtol=2e-2)

    print("KERNEL_OK")
</pallas_src>

<mosaic_0001>
module attributes {stable_mosaic.version = 11 : i64} {
  func.func @_agg_kernel(%arg0: i32, %arg1: i32, %arg2: i32, %arg3: memref<64x128xbf16, #tpu.memory_space<vmem>>, %arg4: memref<128x128xbf16, #tpu.memory_space<vmem>>, %arg5: memref<1x128xf32, #tpu.memory_space<vmem>>, %arg6: memref<64x1xf32, #tpu.memory_space<vmem>>, %arg7: memref<64x128xf32, #tpu.memory_space<vmem>>) attributes {dimension_semantics = [#tpu.dimension_semantics<parallel>, #tpu.dimension_semantics<parallel>, #tpu.dimension_semantics<arbitrary>], iteration_bounds = array<i64: 1, 2, 5>, scalar_prefetch = 0 : i64, scratch_operands = 0 : i64, tpu.core_type = #tpu.core_type<tc>, window_params = [{transform_indices = @transform_0, window_bounds = array<i64: 64, 128>}, {transform_indices = @transform_1, window_bounds = array<i64: 128, 128>}, {transform_indices = @transform_2, window_bounds = array<i64: 1, 128>}, {transform_indices = @transform_3, window_bounds = array<i64: 64, 1>}, {transform_indices = @transform_4, window_bounds = array<i64: 64, 128>}]} {
    %c0_i32 = arith.constant 0 : i32
    %0 = arith.cmpi eq, %arg2, %c0_i32 : i32
    %1 = arith.extui %0 : i1 to i32
    %c0_i32_0 = arith.constant 0 : i32
    %2 = arith.cmpi ne, %1, %c0_i32_0 : i32
    scf.if %2 {
      %cst_13 = arith.constant 0.000000e+00 : f32
      %17 = vector.broadcast %cst_13 : f32 to vector<64x128xf32>
      %c0_14 = arith.constant 0 : index
      %c0_15 = arith.constant 0 : index
      %18 = vector.load %arg7[%c0_14, %c0_15] : memref<64x128xf32, #tpu.memory_space<vmem>>, vector<64x128xf32>
      tpu.vector_store %arg7[%c0_14, %c0_15], %17 {strides = array<i32>} : memref<64x128xf32, #tpu.memory_space<vmem>>, vector<64x128xf32>,
    } else {
    }
    %c0 = arith.constant 0 : index
    %c0_1 = arith.constant 0 : index
    %3 = vector.load %arg3[%c0, %c0_1] : memref<64x128xbf16, #tpu.memory_space<vmem>>, vector<64x128xbf16>
    %c0_2 = arith.constant 0 : index
    %c0_3 = arith.constant 0 : index
    %4 = vector.load %arg4[%c0_2, %c0_3] : memref<128x128xbf16, #tpu.memory_space<vmem>>, vector<128x128xbf16>
    %cst = arith.constant dense<0.000000e+00> : vector<64x128xf32>
    %5 = tpu.matmul %3, %4, %cst {dimension_numbers = #tpu.dot_dimension_numbers<[1], [0], [0], [1], [0, 0, 1, 1], [], []>} : vector<64x128xbf16>, vector<128x128xbf16>, vector<64x128xf32> -> vector<64x128xf32>
    %c0_4 = arith.constant 0 : index
    %c0_5 = arith.constant 0 : index
    %6 = vector.load %arg5[%c0_4, %c0_5] : memref<1x128xf32, #tpu.memory_space<vmem>>, vector<1x128xf32>
    %7 = vector.broadcast %6 : vector<1x128xf32> to vector<64x128xf32>
    %8 = arith.addf %5, %7 : vector<64x128xf32>
    %cst_6 = arith.constant 0.000000e+00 : f32
    %9 = vector.broadcast %cst_6 : f32 to vector<64x128xf32>
    %10 = arith.maximumf %8, %9 : vector<64x128xf32>
    %c0_7 = arith.constant 0 : index
    %c0_8 = arith.constant 0 : index
    %11 = vector.load %arg7[%c0_7, %c0_8] : memref<64x128xf32, #tpu.memory_space<vmem>>, vector<64x128xf32>
    %c0_9 = arith.constant 0 : index
    %c0_10 = arith.constant 0 : index
    %12 = vector.load %arg6[%c0_9, %c0_10] : memref<64x1xf32, #tpu.memory_space<vmem>>, vector<64x1xf32>
    %13 = vector.broadcast %12 : vector<64x1xf32> to vector<64x128xf32>
    %14 = arith.mulf %13, %10 : vector<64x128xf32>
    %15 = arith.addf %11, %14 : vector<64x128xf32>
    %c0_11 = arith.constant 0 : index
    %c0_12 = arith.constant 0 : index
    %16 = vector.load %arg7[%c0_11, %c0_12] : memref<64x128xf32, #tpu.memory_space<vmem>>, vector<64x128xf32>
    tpu.vector_store %arg7[%c0_11, %c0_12], %15 {strides = array<i32>} : memref<64x128xf32, #tpu.memory_space<vmem>>, vector<64x128xf32>,
    return
  }
  func.func @transform_0(%arg0: i32, %arg1: i32, %arg2: i32) -> (i32, i32) {
    %c2_i32 = arith.constant 2 : i32
    %0 = arith.muli %arg2, %c2_i32 : i32
    %1 = arith.addi %0, %arg1 : i32
    %c0_i32 = arith.constant 0 : i32
    %c0_i32_0 = arith.constant 0 : i32
    return %1, %c0_i32 : i32, i32
  }
  func.func @transform_1(%arg0: i32, %arg1: i32, %arg2: i32) -> (i32, i32) {
    %c0_i32 = arith.constant 0 : i32
    %c0_i32_0 = arith.constant 0 : i32
    return %c0_i32, %arg0 : i32, i32
  }
  func.func @transform_2(%arg0: i32, %arg1: i32, %arg2: i32) -> (i32, i32) {
    %c0_i32 = arith.constant 0 : i32
    %c0_i32_0 = arith.constant 0 : i32
    return %c0_i32, %arg0 : i32, i32
  }
  func.func @transform_3(%arg0: i32, %arg1: i32, %arg2: i32) -> (i32, i32) {
    %c2_i32 = arith.constant 2 : i32
    %0 = arith.muli %arg2, %c2_i32 : i32
    %1 = arith.addi %0, %arg1 : i32
    %c0_i32 = arith.constant 0 : i32
    %c0_i32_0 = arith.constant 0 : i32
    return %1, %c0_i32 : i32, i32
  }
  func.func @transform_4(%arg0: i32, %arg1: i32, %arg2: i32) -> (i32, i32) {
    %c0_i32 = arith.constant 0 : i32
    return %arg1, %arg0 : i32, i32
  }
}

</mosaic_0001>

<bundles_post_ra>
// kernel: _aggregate_batched.1
= control target key start
LH: loop header
LB: loop body
LE: loop exit
PB: predicated region body
PF: predicated region fallthrough
CT: control target
= control target key end

     0   :  { %s908_s15 = smov 0   ;;  %s910_s16 = smov 0   ;;  %s1035_s0 = inlined_call_operand.vmem [shape: bf16[640,128], index: 0, kind: input, shape index: {}]   ;;  %s1036_s1 = inlined_call_operand.vmem [shape: bf16[128,128], index: 1, kind: input, shape index: {}]   ;;  %s1037_s2 = inlined_call_operand.vmem [shape: f32[1,128], index: 2, kind: input, shape index: {}]   ;;  %s1038_s3 = inlined_call_operand.vmem [shape: f32[640,1], index: 3, kind: input, shape index: {}]   ;;  %s1039_s4 = inlined_call_operand.vmem [shape: f32[128,128], index: 4, kind: output, shape index: {}]  }
   0x1   :  { %s912_s17 = smov 0   ;;  %s914_s18 = smov 0  }
   0x2   :  { %s916_s19 = smov 0  }
   0x3 LB: > { %s26_s20 = sadd.s32 1, %s871_s17  ;;  %s29_s21 = sadd.s32 1, %s875_s18  ;;  %s879_s19 = sphi %s916_s19, %s14_s19   ;;  %s875_s18 = sphi %s914_s18, %s1043_s18   ;;  %s871_s17 = sphi %s912_s17, %s1042_s17   ;;  %s867_s16 = sphi %s910_s16, %s1041_s16   ;;  %s863_s15 = sphi %s908_s15, %s1040_s15  }
   0x4   : > { %p27_p0 = scmp.ge.s32.totalorder %s26_s20, 5  ;;  %p708_p1 = scmp.ge.s32.totalorder %s879_s19, 1 }
   0x5   : > { %p228_p2 = scmp.lt.s32.totalorder %s879_s19, 11 }
   0x6   : > { %s1045_s20 = smov (%p27_p0, %s26_s20), 0  ;;  %s1047_s21 = smov (!%p27_p0, %s29_s21), %s875_s18 }
   0x7   : > { %p229_p3 = pnand %p708_p1, %p228_p2  ;;  %p31_p4 = scmp.ge.s32.totalorder %s1047_s21, 2 }
   0x8   : > { %s709_s22 = sshll.u32 (!%p229_p3), %s863_s15, 1  ;;  %s715_s23 = sshll.u32 (!%p229_p3), %s867_s16, 3 }
   0x9   : > { %s1049_s21 = smov (%p31_p4, %s1047_s21), 0  ;;  %232 = sbr.rel (%p229_p3) target bundleno = 285 (0x11d), region = 36 }
   0xa   : > { %s274_s24 = sadd.s32 (!%p229_p3), %s867_s16, %s709_s22  ;;  %p301_p5 = scmp.lt.s32.totalorder (!%p229_p3), %s715_s23, 15 }
   0xb   : > { %s710_s25 = sshll.u32 (!%p229_p3), %s274_s24, 3  ;;  %p717_p7 = scmp.ne.s32.totalorder (!%p229_p3), %s863_s15, 0 }
   0xc   : > { %p276_p6 = scmp.lt.s32.totalorder (!%p229_p3), %s710_s25, 79 }
  0x10   : > { %s1051_s23 = smov (!%p301_p5, %s715_s23), 15  ;;  %s1053_s25 = smov (!%p276_p6, %s710_s25), 79 }
  0x11   : > { %s716_s26 = sshll.u32 %s1051_s23, 3  ;;  %s711_s27 = sshll.u32 %s1053_s25, 2  ;;  %v881_v0 = vmov (!%p717_p7), 0.0  }
  0x12   : > { %s714_s28 = sshll.u32 %s1053_s25, 3  ;;  %s944_s5 = scalar_lea.vmem %s1035_s0, %s711_s27 }
  0x13   : > { %s949_s8 = scalar_lea.vmem %s1038_s3, %s714_s28  ;;  %s954_s11 = scalar_lea.vmem %s1039_s4, %s716_s26 }
  0x14   : > { %313 = sbr.rel (%p717_p7) target bundleno = 27 (0x1b), region = 40  ;;  %314 = vst [vmem:[%s954_s11] sm:$0xff] (!%p717_p7), %v881_v0  ;;  %315 = vst [vmem:[%s954_s11 + $0x8] sm:$0xff] (!%p717_p7), %v881_v0 }
  0x15   : > { %316 = vst [vmem:[%s954_s11 + $0x10] sm:$0xff] (!%p717_p7), %v881_v0  ;;  %317 = vst [vmem:[%s954_s11 + $0x18] sm:$0xff] (!%p717_p7), %v881_v0 }
  0x16   : > { %318 = vst [vmem:[%s954_s11 + $0x20] sm:$0xff] (!%p717_p7), %v881_v0  ;;  %319 = vst [vmem:[%s954_s11 + $0x28] sm:$0xff] (!%p717_p7), %v881_v0 }
  0x17   : > { %320 = vst [vmem:[%s954_s11 + $0x30] sm:$0xff] (!%p717_p7), %v881_v0  ;;  %321 = vst [vmem:[%s954_s11 + $0x38] sm:$0xff] (!%p717_p7), %v881_v0 }
  0x1b PF: > { %v829_v1 = vld [vmem:[%s1036_s1] sm:$0xff]   ;;  %v830_v2 = vld [vmem:[%s1036_s1 + $0x8] sm:$0xff]   ;;  %v882_v3 = vmov 0   ;;  %v831_v4 = vld [vmem:[%s1036_s1 + $0x10] sm:$0xff]  }
  0x1c   : > { %828 = vset.pattern.permute.xlu1 %v882_v3  ;;  %827 = vset.pattern.permute.xlu0 %v882_v3  ;;  %v832_v5 = vld [vmem:[%s1036_s1 + $0x18] sm:$0xff]   ;;  %v837_v6 = vld [vmem:[%s944_s5] sm:$0xff]   ;;  %v838_v7 = vld [vmem:[%s944_s5 + $0x10] sm:$0xff]  }
  0x1d   : > { %745 = vmatprep.subr.bf16.mxu0 %v829_v1  ;;  %769 = vmatprep.subr.bf16.mxu1 %v829_v1  ;;  %v833_v8 = vld [vmem:[%s1036_s1 + $0x20] sm:$0xff]   ;;  %v508_v9 = vld [vmem:[%s949_s8 + $0x10] sm:$0xff]  ;;  %v509_v11 = vld [vmem:[%s949_s8 + $0x18] sm:$0xff] }
  0x1e   : > { %746 = vmatpush3.bf16.msra.mxu0 %v829_v1  ;;  %777 = vmatpush3.bf16.msra.mxu1 %v829_v1  ;;  %v506_v10 = vld [vmem:[%s949_s8] sm:$0xff]  ;;  %v507_v12 = vld [vmem:[%s949_s8 + $0x8] sm:$0xff]  ;;  %v835_v16 = vld [vmem:[%s1036_s1 + $0x30] sm:$0xff]  }
  0x1f   : > { %747 = vmatprep.subr.bf16.mxu0 %v830_v2  ;;  %770 = vmatprep.subr.bf16.mxu1 %v830_v2  ;;  %v834_v13 = vld [vmem:[%s1036_s1 + $0x28] sm:$0xff]   ;;  %v510_v15 = vld [vmem:[%s949_s8 + $0x20] sm:$0xff]  ;;  %v513_v17 = vld [vmem:[%s949_s8 + $0x38] sm:$0xff] }
  0x20   : > { %761 = vmatprep.mubr.bf16.mxu0 %v837_v6  ;;  %765 = vmatprep.mubr.bf16.mxu1 %v838_v7  ;;  %v511_v14 = vld [vmem:[%s949_s8 + $0x28] sm:$0xff]  ;;  %v512_v18 = vld [vmem:[%s949_s8 + $0x30] sm:$0xff]  ;;  %v836_v19 = vld [vmem:[%s1036_s1 + $0x38] sm:$0xff]  }
  0x21   : > { %526 = vperm.xlu1 %828, %v508_v9   ;;  %516 = vperm.xlu0 %827, %v506_v10   ;;  %v839_v20 = vld [vmem:[%s944_s5 + $0x8] sm:$0xff]   ;;  %v840_v21 = vld [vmem:[%s944_s5 + $0x18] sm:$0xff]   ;;  %v718_v27 = vld [vmem:[%s1037_s2] ss:$0 sm:$0xff] }
  0x22   : > { %748 = vmatpush3.bf16.msra.mxu0 %v830_v2  ;;  %778 = vmatpush3.bf16.msra.mxu1 %v830_v2  ;;  %v500_v46 = vld [vmem:[%s954_s11 + $0x10] sm:$0xff]  ;;  %v498_v54 = vld [vmem:[%s954_s11] sm:$0xff]  ;;  %v501_v61 = vld [vmem:[%s954_s11 + $0x18] sm:$0xff] }
  0x23   : > { %749 = vmatprep.subr.bf16.mxu0 %v831_v4  ;;  %771 = vmatprep.subr.bf16.mxu1 %v831_v4  ;;  %v504_v47 = vld [vmem:[%s954_s11 + $0x30] sm:$0xff]  ;;  %v502_v55 = vld [vmem:[%s954_s11 + $0x20] sm:$0xff]  ;;  %v505_v62 = vld [vmem:[%s954_s11 + $0x38] sm:$0xff] }
  0x24   : > { %v503_v6 = vld [vmem:[%s954_s11 + $0x28] sm:$0xff] }
  0x25   : > { %531 = vperm.xlu1 %828, %v509_v11   ;;  %521 = vperm.xlu0 %827, %v507_v12  }
  0x26   : > { %750 = vmatpush3.bf16.msra.mxu0 %v831_v4  ;;  %779 = vmatpush3.bf16.msra.mxu1 %v831_v4 }
  0x27   : > { %751 = vmatprep.subr.bf16.mxu0 %v832_v5  ;;  %772 = vmatprep.subr.bf16.mxu1 %v832_v5 }
  0x29   : > { %541 = vperm.xlu1 %828, %v511_v14   ;;  %536 = vperm.xlu0 %827, %v510_v15  }
  0x2a   : > { %752 = vmatpush3.bf16.msra.mxu0 %v832_v5  ;;  %780 = vmatpush3.bf16.msra.mxu1 %v832_v5  ;;  %v499_v5 = vld [vmem:[%s954_s11 + $0x8] sm:$0xff] }
  0x2b   : > { %753 = vmatprep.subr.bf16.mxu0 %v833_v8  ;;  %773 = vmatprep.subr.bf16.mxu1 %v833_v8 }
  0x2d   : > { %551 = vperm.xlu1 %828, %v513_v17   ;;  %546 = vperm.xlu0 %827, %v512_v18  }
  0x2e   : > { %754 = vmatpush3.bf16.msra.mxu0 %v833_v8  ;;  %781 = vmatpush3.bf16.msra.mxu1 %v833_v8 }
  0x2f   : > { %755 = vmatprep.subr.bf16.mxu0 %v834_v13  ;;  %774 = vmatprep.subr.bf16.mxu1 %v834_v13 }
  0x32   : > { %756 = vmatpush3.bf16.msra.mxu0 %v834_v13  ;;  %782 = vmatpush3.bf16.msra.mxu1 %v834_v13 }
  0x33   : > { %757 = vmatprep.subr.bf16.mxu0 %v835_v16  ;;  %775 = vmatprep.subr.bf16.mxu1 %v835_v16 }
  0x36   : > { %758 = vmatpush3.bf16.msra.mxu0 %v835_v16  ;;  %783 = vmatpush3.bf16.msra.mxu1 %v835_v16 }
  0x37   : > { %759 = vmatprep.subr.bf16.mxu0 %v836_v19  ;;  %776 = vmatprep.subr.bf16.mxu1 %v836_v19 }
  0x3a   : > { %760 = vmatpush3.bf16.msra.mxu0 %v836_v19  ;;  %784 = vmatpush3.bf16.msra.mxu1 %v836_v19 }
  0x3d   : > { %762 = vmatmul.mubr.bf16.vlgmr.msra.gmra.mrb[0].mxu0 %v839_v20  ;;  %766 = vmatmul.mubr.bf16.vlgmr.msra.gmra.mrb[0].mxu1 %v840_v21 }
  0xa0   : > { %v517_v22 = vpop.permute.xlu0 %516  ;;  %v527_v23 = vpop.permute.xlu1 %526 }
  0xa4   : > { %v522_v24 = vpop.permute.xlu0 %521  ;;  %v532_v25 = vpop.permute.xlu1 %531 }
  0xa8   : > { %v537_v26 = vpop.permute.xlu0 %536  ;;  %v542_v28 = vpop.permute.xlu1 %541 }
  0xac   : > { %v547_v45 = vpop.permute.xlu0 %546  ;;  %v552_v58 = vpop.permute.xlu1 %551 }
 0x110   : > { %v763_v29 = vpop.f32.mrb[0].mxu0  ;;  %v767_v30 = vpop.f32.mrb[0].mxu1 }
 0x111   : > { %v468_v31 = vadd.f32 %v763_v29, %v718_v27  ;;  %v484_v32 = vadd.f32 %v767_v30, %v718_v27  ;;  %v459_v33 = vpop.f32.mrb[1].mxu0  ;;  %v475_v34 = vpop.f32.mrb[1].mxu1 }
 0x112   : > { %v460_v35 = vadd.f32 %v718_v27, %v459_v33  ;;  %v476_v36 = vadd.f32 %v718_v27, %v475_v34  ;;  %v764_v37 = vpop.f32.mrb[2].mxu0  ;;  %v768_v38 = vpop.f32.mrb[2].mxu1 }
 0x113   : > { %v492_v39 = vmax.f32 %v468_v31, 0.0  ;;  %v496_v40 = vmax.f32 %v484_v32, 0.0  ;;  %v471_v41 = vadd.f32 %v764_v37, %v718_v27  ;;  %v487_v42 = vadd.f32 %v768_v38, %v718_v27  ;;  %v462_v43 = vpop.f32.mrb[3].mxu0  ;;  %v478_v44 = vpop.f32.mrb[3].mxu1 }
 0x114   : > { %v490_v48 = vmax.f32 %v460_v35, 0.0  ;;  %v494_v49 = vmax.f32 %v476_v36, 0.0  ;;  %v463_v50 = vadd.f32 %v718_v27, %v462_v43  ;;  %v479_v51 = vadd.f32 %v718_v27, %v478_v44 }
 0x115   : > { %v556_v52 = vmul.f32 %v527_v23, %v492_v39  ;;  %v560_v53 = vmul.f32 %v547_v45, %v496_v40  ;;  %v493_v56 = vmax.f32 %v471_v41, 0.0  ;;  %v497_v57 = vmax.f32 %v487_v42, 0.0 }
 0x116   : > { %v554_v59 = vmul.f32 %v517_v22, %v490_v48  ;;  %v558_v60 = vmul.f32 %v537_v26, %v494_v49  ;;  %v491_v63 = vmax.f32 %v463_v50, 0.0  ;;  %v495_v0 = vmax.f32 %v479_v51, 0.0 }
 0x117   : > { %v564_v1 = vadd.f32 %v556_v52, %v500_v46  ;;  %v568_v2 = vadd.f32 %v560_v53, %v504_v47  ;;  %v557_v3 = vmul.f32 %v532_v25, %v493_v56  ;;  %v561_v4 = vmul.f32 %v552_v58, %v497_v57 }
 0x118   : > { %v562_v7 = vadd.f32 %v554_v59, %v498_v54  ;;  %v566_v8 = vadd.f32 %v558_v60, %v502_v55  ;;  %v555_v9 = vmul.f32 %v522_v24, %v491_v63  ;;  %v559_v10 = vmul.f32 %v542_v28, %v495_v0 }
 0x119   : > { %572 = vst [vmem:[%s954_s11 + $0x10] sm:$0xff] %v564_v1  ;;  %576 = vst [vmem:[%s954_s11 + $0x30] sm:$0xff] %v568_v2  ;;  %v565_v11 = vadd.f32 %v557_v3, %v501_v61  ;;  %v569_v12 = vadd.f32 %v561_v4, %v505_v62 }
 0x11a   : > { %570 = vst [vmem:[%s954_s11] sm:$0xff] %v562_v7  ;;  %574 = vst [vmem:[%s954_s11 + $0x20] sm:$0xff] %v566_v8  ;;  %v563_v13 = vadd.f32 %v555_v9, %v499_v5  ;;  %v567_v14 = vadd.f32 %v559_v10, %v503_v6 }
 0x11b   : > { %573 = vst [vmem:[%s954_s11 + $0x18] sm:$0xff] %v565_v11  ;;  %577 = vst [vmem:[%s954_s11 + $0x38] sm:$0xff] %v569_v12 }
 0x11c   : > { %571 = vst [vmem:[%s954_s11 + $0x8] sm:$0xff] %v563_v13  ;;  %575 = vst [vmem:[%s954_s11 + $0x28] sm:$0xff] %v567_v14 }
 0x11d PF: > { %s14_s19 = sadd.s32 1, %s879_s19   ;;  %s1040_s15 = smov %s871_s17 }
 0x11e   : > { %p11_p8 = scmp.ge.s32.totalorder %s14_s19, 12   ;;  %s1041_s16 = smov %s875_s18 }
 0x11f   : > { %s1042_s17 = smov %s1045_s20  ;;  %s1043_s18 = smov %s1049_s21 }
 0x120   :  { %13 = sbr.rel (!%p11_p8) target bundleno = 3 (0x3), region = 79 }

</bundles_post_ra>
